<compile_context>
chip_gen: v7x
topology: tpu7x:2x2x1
jax: 0.10.0
libtpu: 0.0.40
codegen_flags: <defaults>
</compile_context>

<pallas_src>
import jax
import jax.numpy as jnp
from jax.experimental import pallas as pl
from jax.experimental.pallas import tpu as pltpu


def _mul_kernel(scale_ref, x_ref, o_ref):
    # scale_ref: (1, C) row, x_ref: (TR, C) tile.
    # Row broadcast across sublanes on the VPU; lane dim (C) is dense.
    o_ref[...] = x_ref[...] * scale_ref[...]


def _pick_row_tile(rows, c, itemsize, vmem_budget_bytes):
    """Largest row tile (multiple of 8, or full `rows`) whose double-buffered
    in+out blocks fit the VMEM budget."""
    full_bytes = rows * c * itemsize
    # 2 buffers (pipeline) x (input tile + output tile) + resident scale row.
    if 4 * full_bytes + c * itemsize <= vmem_budget_bytes:
        return rows  # single block, grid=(1,)
    tr = (vmem_budget_bytes // (4 * c * itemsize)) // 8 * 8
    tr = max(8, min(int(tr), rows))
    return tr


def channel_scale_mul(x633, x628):
    """x633: (1, C, 1, 1), x628: (N, C, H, W). Returns x633 * x628 in NCHW."""
    n, c, h, w = x628.shape
    assert x633.shape == (1, c, 1, 1)
    rows = n * h * w

    # Channels-last, lane-dense 2-D views.
    x2d = jnp.transpose(x628, (0, 2, 3, 1)).reshape(rows, c)   # (N*H*W, C)
    s2d = x633.reshape(1, c)                                   # (1, C)

    itemsize = jnp.dtype(x628.dtype).itemsize
    # Conservative budget that fits every generation's scoped VMEM default
    # (v5e: 16 MiB, v6e/v7x: 32 MiB scoped).
    vmem_budget = 12 * 1024 * 1024
    tr = _pick_row_tile(rows, c, itemsize, vmem_budget)

    grid = (pl.cdiv(rows, tr),)

    out2d = pl.pallas_call(
        _mul_kernel,
        out_shape=jax.ShapeDtypeStruct((rows, c), x628.dtype),
        grid_spec=pltpu.PrefetchScalarGridSpec(
            num_scalar_prefetch=0,
            grid=grid,
            in_specs=[
                # Scale row stays resident: same (0, 0) block every step.
                pl.BlockSpec((1, c), lambda i: (0, 0)),
                pl.BlockSpec((tr, c), lambda i: (i, 0)),
            ],
            out_specs=pl.BlockSpec((tr, c), lambda i: (i, 0)),
        ),
        compiler_params=pltpu.CompilerParams(
            dimension_semantics=("parallel",),
        ),
    )(s2d, x2d)

    # Back to NCHW.
    return jnp.transpose(out2d.reshape(n, h, w, c), (0, 3, 1, 2))


if __name__ == "__main__":
    key = jax.random.PRNGKey(0)
    k1, k2 = jax.random.split(key)

    # Shapes implied by the module's forward.
    C, H, W = 2064, 7, 7
    x628 = jax.random.normal(k1, (1, C, H, W), dtype=jnp.float32)
    x633 = jax.random.normal(k2, (1, C, 1, 1), dtype=jnp.float32)

    out = channel_scale_mul(x633, x628)
    out = jax.block_until_ready(out)

    ref = x633 * x628
    assert out.shape == (1, C, H, W)
    assert jnp.allclose(out, ref, atol=1e-6, rtol=1e-6)

    print("KERNEL_OK")
</pallas_src>

<mosaic_0001>
module attributes {stable_mosaic.version = 11 : i64} {
  func.func @_mul_kernel(%arg0: i32, %arg1: memref<1x2064xf32, #tpu.memory_space<vmem>>, %arg2: memref<49x2064xf32, #tpu.memory_space<vmem>>, %arg3: memref<49x2064xf32, #tpu.memory_space<vmem>>) attributes {dimension_semantics = [#tpu.dimension_semantics<parallel>], iteration_bounds = array<i64: 1>, scalar_prefetch = 0 : i64, scratch_operands = 0 : i64, tpu.core_type = #tpu.core_type<tc>, window_params = [{pipeline_mode = #tpu.pipeline_mode<synchronous>, transform_indices = @transform_0, window_bounds = array<i64: 1, 2064>}, {transform_indices = @transform_1, window_bounds = array<i64: 49, 2064>}, {transform_indices = @transform_2, window_bounds = array<i64: 49, 2064>}]} {
    %c0 = arith.constant 0 : index
    %c0_0 = arith.constant 0 : index
    %0 = vector.load %arg2[%c0, %c0_0] : memref<49x2064xf32, #tpu.memory_space<vmem>>, vector<49x2064xf32>
    %c0_1 = arith.constant 0 : index
    %c0_2 = arith.constant 0 : index
    %1 = vector.load %arg1[%c0_1, %c0_2] : memref<1x2064xf32, #tpu.memory_space<vmem>>, vector<1x2064xf32>
    %2 = vector.broadcast %1 : vector<1x2064xf32> to vector<49x2064xf32>
    %3 = arith.mulf %0, %2 : vector<49x2064xf32>
    %c0_3 = arith.constant 0 : index
    %c0_4 = arith.constant 0 : index
    %4 = vector.load %arg3[%c0_3, %c0_4] : memref<49x2064xf32, #tpu.memory_space<vmem>>, vector<49x2064xf32>
    tpu.vector_store %arg3[%c0_3, %c0_4], %3 {strides = array<i32>} : memref<49x2064xf32, #tpu.memory_space<vmem>>, vector<49x2064xf32>,
    return
  }
  func.func @transform_0(%arg0: i32) -> (i32, i32) {
    %c0_i32 = arith.constant 0 : i32
    %c0_i32_0 = arith.constant 0 : i32
    %c0_i32_1 = arith.constant 0 : i32
    return %c0_i32, %c0_i32_0 : i32, i32
  }
  func.func @transform_1(%arg0: i32) -> (i32, i32) {
    %c0_i32 = arith.constant 0 : i32
    %c0_i32_0 = arith.constant 0 : i32
    return %arg0, %c0_i32 : i32, i32
  }
  func.func @transform_2(%arg0: i32) -> (i32, i32) {
    %c0_i32 = arith.constant 0 : i32
    %c0_i32_0 = arith.constant 0 : i32
    return %arg0, %c0_i32 : i32, i32
  }
}

</mosaic_0001>

<bundles_post_ra>
// kernel: tpu_custom_call.1
= control target key start
LH: loop header
LB: loop body
LE: loop exit
PB: predicated region body
PF: predicated region fallthrough
CT: control target
= control target key end

     0   :  { %7 = vsyncpa [#allocation3], 0  ;;  %s815_s0 = inlined_call_operand.hbm [shape: f32[1,2064], index: 0, kind: input, shape index: {}]   ;;  %s816_s1 = inlined_call_operand.hbm [shape: f32[49,2064], index: 1, kind: input, shape index: {}]   ;;  %s817_s2 = inlined_call_operand.hbm [shape: f32[49,2064], index: 2, kind: output, shape index: {}]  }
   0x1   :  { %8 = vsyncpa [#allocation6], 0 }
   0x2   :  { %9 = vsyncpa [#allocation4], 0  ;;  %s584_s9 = smov [#allocation2]   ;;  %s585_s11 = smov [#allocation5]  }
   0x3   :  { %s16_s10 = sshll.u32 %s584_s9, 4  ;;  %s25_s12 = sshll.u32 %s585_s11, 4  ;;  %s17_s10 = int_to_ptr.vmem [resolvable:$true] %s16_s10  ;;  %s604_s12 = int_to_ptr.vmem [resolvable:$true] %s25_s12 }
   0x4   :  { %s512_s15 = scalar_lea.hbm %s815_s0, 272 }
   0x5   :  { %p513_p0 = scmp.ne.s32.totalorder %s815_s0, %s512_s15  ;;  %p516_p1 = scmp.lt.u32.totalorder %s512_s15, %s815_s0 }
   0x7   :  { %p518_p2 = pnand %p516_p1, %p513_p0 }
   0x9   :  { %521 = shalt.err (!%p518_p2)
}
   0xa   :  { %s522_s20 = scalar_lea.vmem %s17_s10, 272  ;;  %s526_s21 = scalar_lea.vmem %s17_s10, 288 }
   0xb   :  { %p523_p3 = scmp.ne.s32.totalorder %s17_s10, %s522_s20  ;;  %p527_p4 = scmp.lt.s32.totalorder %s17_s10, %s17_s10 }
   0xc   :  { %p528_p5 = scmp.lt.s32.totalorder %s526_s21, %s522_s20 }
   0xe   :  { %p529_p6 = por %p528_p5, %p527_p4 }
  0x10   :  { %p530_p7 = pnand %p529_p6, %p523_p3 }
  0x12   :  { %533 = shalt.err (!%p530_p7)
}
  0x13   :  { %19 = dma.hbm_to_vmem [thread:$0]  %s815_s0, 272, %s17_s10, [#allocation3]  }
  0x14   :  { %s534_s26 = scalar_lea.hbm %s816_s1, 15232 }
  0x15   :  { %p535_p8 = scmp.ne.s32.totalorder %s816_s1, %s534_s26  ;;  %p538_p9 = scmp.lt.u32.totalorder %s534_s26, %s816_s1 }
  0x17   :  { %p540_p10 = pnand %p538_p9, %p535_p8 }
  0x19   :  { %543 = shalt.err (!%p540_p10)
}
  0x1a   :  { %s544_s3 = scalar_lea.vmem %s604_s12, 15232  ;;  %p549_p12 = scmp.lt.s32.totalorder %s604_s12, %s604_s12 }
  0x1b   :  { %p545_p11 = scmp.ne.s32.totalorder %s604_s12, %s544_s3  ;;  %p550_p13 = scmp.lt.s32.totalorder %s544_s3, %s544_s3 }
  0x1d   :  { %p551_p0 = por %p550_p13, %p549_p12 }
  0x1f   :  { %p552_p1 = pnand %p551_p0, %p545_p11 }
  0x21   :  { %555 = shalt.err (!%p552_p1)
}
  0x22   :  { %s586_s0 = smov 2176   ;;  %s587_s4 = smov 136  }
  0x23   :  { %31 = dma.hbm_to_vmem [thread:$0]  %s816_s1, 15232, %s604_s12, [#allocation6], %s586_s0, %s586_s0, %s587_s4  }
  0x24   :  { %578 = dma.done.wait [#allocation3], 272  }
  0x25   :  { %579 = vsyncadd [#allocation3], 4294967024 }
  0x26   :  { %580 = dma.done.wait [#allocation6], 15232  }
  0x27   :  { %581 = vsyncadd [#allocation6], 4294952064  ;;  %v163_v0 = vlaneseq  ;;  %v38_v10 = vld [vmem:[#allocation5] sm:$0xff]  ;;  %v157_v11 = vld [vmem:[#allocation2] sm:$0xff]  ;;  %vm383_vm0 = vcmask 130048   ;;  %s588_s1 = smov [#allocation7]  }
  0x28   :  { %v39_v12 = vld [vmem:[#allocation5 + $0x8] sm:$0xff]  ;;  %v40_v15 = vld [vmem:[#allocation5 + $0x10] sm:$0xff]  ;;  %v41_v17 = vld [vmem:[#allocation5 + $0x18] sm:$0xff]  ;;  %s776_s7 = sshll.u32 %s588_s1, 4  ;;  %vm486_vm1 = vcmask 122880   ;;  %s494_s7 = int_to_ptr.vmem [resolvable:$true] %s776_s7 }
  0x29   :  { %v164_v1 = vshrl.u32 %v163_v0, 7  ;;  %v42_v19 = vld [vmem:[#allocation5 + $0x20] sm:$0xff]  ;;  %v43_v21 = vld [vmem:[#allocation5 + $0x28] sm:$0xff]  ;;  %v44_v23 = vld [vmem:[#allocation5 + $0x30] sm:$0xff]  ;;  %s556_s8 = scalar_lea.vmem %s494_s7, 15232  ;;  %p561_p3 = scmp.lt.s32.totalorder %s494_s7, %s494_s7 }
  0x2a   :  { %v45_v25 = vld [vmem:[#allocation5 + $0x38] sm:$0xff]  ;;  %v46_v31 = vld [vmem:[#allocation5 + $0x40] sm:$0xff]  ;;  %v47_v33 = vld [vmem:[#allocation5 + $0x48] sm:$0xff]  ;;  %p557_p2 = scmp.ne.s32.totalorder %s494_s7, %s556_s8  ;;  %p562_p4 = scmp.lt.s32.totalorder %s556_s8, %s556_s8 }
  0x2b   :  { %v165_v2 = vsub.s32 0, %v164_v1  ;;  %v169_v3 = vsub.s32 1, %v164_v1  ;;  %v173_v4 = vsub.s32 2, %v164_v1  ;;  %v177_v5 = vsub.s32 3, %v164_v1  ;;  %v158_v32 = vld [vmem:[#allocation2 + $0x8] sm:$0xff]  ;;  %v50_v40 = vld [vmem:[#allocation5 + $0x60] sm:$0xff] }
  0x2c   :  { %v181_v6 = vsub.s32 4, %v164_v1  ;;  %v185_v7 = vsub.s32 5, %v164_v1  ;;  %v189_v8 = vsub.s32 6, %v164_v1  ;;  %v193_v9 = vsub.s32 7, %v164_v1  ;;  %v48_v38 = vld [vmem:[#allocation5 + $0x50] sm:$0xff]  ;;  %v49_v39 = vld [vmem:[#allocation5 + $0x58] sm:$0xff]  ;;  %p563_p5 = por %p562_p4, %p561_p3 }
  0x2d   :  { %v638_v13 = vrot.slane %v157_v11, %v165_v2  ;;  %v640_v14 = vrot.slane %v157_v11, %v169_v3  ;;  %v642_v16 = vrot.slane %v157_v11, %v173_v4  ;;  %v644_v18 = vrot.slane %v157_v11, %v177_v5  ;;  %v51_v45 = vld [vmem:[#allocation5 + $0x68] sm:$0xff]  ;;  %v52_v46 = vld [vmem:[#allocation5 + $0x70] sm:$0xff]  ;;  %v53_v47 = vld [vmem:[#allocation5 + $0x78] sm:$0xff] }
  0x2e   :  { %v646_v20 = vrot.slane %v157_v11, %v181_v6  ;;  %v648_v22 = vrot.slane %v157_v11, %v185_v7  ;;  %v650_v24 = vrot.slane %v157_v11, %v189_v8  ;;  %v652_v26 = vrot.slane %v157_v11, %v193_v9  ;;  %v54_v52 = vld [vmem:[#allocation5 + $0x80] sm:$0xff]  ;;  %v678_v53 = vld [vmem:[#allocation2 + $0x10] ss:$0 sm:$0xff]  ;;  %v55_v54 = vld [vmem:[#allocation5 + $0x88] sm:$0xff]  ;;  %p564_p6 = pnand %p563_p5, %p557_p2 }
  0x2f   :  { %v248_v27 = vmul.f32 %v638_v13, %v38_v10  ;;  %v249_v28 = vmul.f32 %v640_v14, %v39_v12  ;;  %v250_v29 = vmul.f32 %v642_v16, %v40_v15  ;;  %v251_v30 = vmul.f32 %v644_v18, %v41_v17  ;;  %v56_v59 = vld [vmem:[#allocation5 + $0x90] sm:$0xff]  ;;  %v57_v60 = vld [vmem:[#allocation5 + $0x98] sm:$0xff]  ;;  %v58_v61 = vld [vmem:[#allocation5 + $0xa0] sm:$0xff] }
  0x30   :  { %v252_v34 = vmul.f32 %v646_v20, %v42_v19  ;;  %v253_v35 = vmul.f32 %v648_v22, %v43_v21  ;;  %v254_v36 = vmul.f32 %v650_v24, %v44_v23  ;;  %v255_v37 = vmul.f32 %v652_v26, %v45_v25  ;;  %v63_v10 = vld [vmem:[#allocation5 + $0xc8] sm:$0xff]  ;;  %v64_v11 = vld [vmem:[#allocation5 + $0xd0] sm:$0xff]  ;;  %v65_v21 = vld [vmem:[#allocation5 + $0xd8] sm:$0xff] }
  0x31   :  { %367 = vst [vmem:[#allocation7] sm:$0xff] %v248_v27  ;;  %368 = vst [vmem:[#allocation7 + $0x8] sm:$0xff] %v249_v28  ;;  %v662_v41 = vrot.slane %v158_v32, %v165_v2  ;;  %v664_v42 = vrot.slane %v158_v32, %v169_v3  ;;  %v666_v43 = vrot.slane %v158_v32, %v173_v4  ;;  %v59_v2 = vld [vmem:[#allocation5 + $0xa8] sm:$0xff]  ;;  %v60_v3 = vld [vmem:[#allocation5 + $0xb0] sm:$0xff] }
  0x32   :  { %369 = vst [vmem:[#allocation7 + $0x10] sm:$0xff] %v250_v29  ;;  %370 = vst [vmem:[#allocation7 + $0x18] sm:$0xff] %v251_v30  ;;  %v668_v44 = vrot.slane %v158_v32, %v177_v5  ;;  %v670_v48 = vrot.slane %v158_v32, %v181_v6  ;;  %v672_v49 = vrot.slane %v158_v32, %v185_v7  ;;  %v61_v4 = vld [vmem:[#allocation5 + $0xb8] sm:$0xff]  ;;  %v66_v23 = vld [vmem:[#allocation5 + $0xe0] sm:$0xff] }
  0x33   :  { %371 = vst [vmem:[#allocation7 + $0x20] sm:$0xff] %v252_v34  ;;  %372 = vst [vmem:[#allocation7 + $0x28] sm:$0xff] %v253_v35  ;;  %v674_v50 = vrot.slane %v158_v32, %v189_v8  ;;  %v676_v51 = vrot.slane %v158_v32, %v193_v9  ;;  %v256_v55 = vmul.f32 %v662_v41, %v46_v31  ;;  %v62_v9 = vld [vmem:[#allocation5 + $0xc0] sm:$0xff]  ;;  %v67_v25 = vld [vmem:[#allocation5 + $0xe8] sm:$0xff] }
  0x34   :  { %373 = vst [vmem:[#allocation7 + $0x30] sm:$0xff] %v254_v36  ;;  %374 = vst [vmem:[#allocation7 + $0x38] sm:$0xff] %v255_v37  ;;  %v257_v56 = vmul.f32 %v664_v42, %v47_v33  ;;  %v258_v57 = vmul.f32 %v666_v43, %v48_v38  ;;  %v259_v58 = vmul.f32 %v668_v44, %v49_v39  ;;  %v68_v31 = vld [vmem:[#allocation5 + $0xf0] sm:$0xff]  ;;  %v69_v32 = vld [vmem:[#allocation5 + $0xf8] sm:$0xff] }
  0x35   :  { %v260_v62 = vmul.f32 %v670_v48, %v50_v40  ;;  %v261_v63 = vmul.f32 %v672_v49, %v51_v45  ;;  %v262_v0 = vmul.f32 %v674_v50, %v52_v46  ;;  %v263_v1 = vmul.f32 %v676_v51, %v53_v47  ;;  %375 = vst [vmem:[#allocation7 + $0x40] sm:$0xff] %v256_v55  ;;  %v70_v33 = vld [vmem:[#allocation5 + $0x100] sm:$0xff]  ;;  %v71_v38 = vld [vmem:[#allocation5 + $0x108] sm:$0xff]  ;;  %v72_v39 = vld [vmem:[#allocation5 + $0x110] sm:$0xff] }
  0x36   :  { %376 = vst [vmem:[#allocation7 + $0x48] sm:$0xff] %v257_v56  ;;  %377 = vst [vmem:[#allocation7 + $0x50] sm:$0xff] %v258_v57  ;;  %v264_v5 = vmul.f32 %v678_v53, %v54_v52  ;;  %v265_v6 = vmul.f32 %v638_v13, %v55_v54  ;;  %v266_v7 = vmul.f32 %v640_v14, %v56_v59  ;;  %v73_v40 = vld [vmem:[#allocation5 + $0x118] sm:$0xff]  ;;  %v74_v54 = vld [vmem:[#allocation5 + $0x120] sm:$0xff] }
  0x37   :  { %378 = vst [vmem:[#allocation7 + $0x58] sm:$0xff] %v259_v58  ;;  %v267_v8 = vmul.f32 %v642_v16, %v57_v60  ;;  %379 = vst [vmem:[#allocation7 + $0x60] sm:$0xff] %v260_v62  ;;  %v268_v12 = vmul.f32 %v644_v18, %v58_v61  ;;  %v269_v15 = vmul.f32 %v646_v20, %v59_v2  ;;  %v75_v55 = vld [vmem:[#allocation5 + $0x128] sm:$0xff]  ;;  %v76_v56 = vld [vmem:[#allocation5 + $0x130] sm:$0xff] }
  0x38   :  { %380 = vst [vmem:[#allocation7 + $0x68] sm:$0xff] %v261_v63  ;;  %381 = vst [vmem:[#allocation7 + $0x70] sm:$0xff] %v262_v0  ;;  %v270_v17 = vmul.f32 %v648_v22, %v60_v3  ;;  %v271_v19 = vmul.f32 %v650_v24, %v61_v4  ;;  %v272_v27 = vmul.f32 %v652_v26, %v62_v9  ;;  %v77_v60 = vld [vmem:[#allocation5 + $0x138] sm:$0xff]  ;;  %v78_v61 = vld [vmem:[#allocation5 + $0x140] sm:$0xff] }
  0x39   :  { %382 = vst [vmem:[#allocation7 + $0x78] sm:$0xff] %v263_v1  ;;  %384 = vst.msk [vmem:[#allocation7 + $0x80] sm:$0xff] %vm383_vm0, %v264_v5  ;;  %v273_v28 = vmul.f32 %v662_v41, %v63_v10  ;;  %v274_v29 = vmul.f32 %v664_v42, %v64_v11  ;;  %v275_v30 = vmul.f32 %v666_v43, %v65_v21  ;;  %v79_v62 = vld [vmem:[#allocation5 + $0x148] sm:$0xff]  ;;  %v80_v2 = vld [vmem:[#allocation5 + $0x150] sm:$0xff] }
  0x3a   :  { %385 = vst [vmem:[#allocation7 + $0x88] sm:$0xff] %v265_v6  ;;  %386 = vst [vmem:[#allocation7 + $0x90] sm:$0xff] %v266_v7  ;;  %v276_v34 = vmul.f32 %v668_v44, %v66_v23  ;;  %v277_v35 = vmul.f32 %v670_v48, %v67_v25  ;;  %v278_v36 = vmul.f32 %v672_v49, %v68_v31  ;;  %v81_v3 = vld [vmem:[#allocation5 + $0x158] sm:$0xff]  ;;  %v82_v4 = vld [vmem:[#allocation5 + $0x160] sm:$0xff] }
  0x3b   :  { %387 = vst [vmem:[#allocation7 + $0x98] sm:$0xff] %v267_v8  ;;  %388 = vst [vmem:[#allocation7 + $0xa0] sm:$0xff] %v268_v12  ;;  %v279_v37 = vmul.f32 %v674_v50, %v69_v32  ;;  %v280_v45 = vmul.f32 %v676_v51, %v70_v33  ;;  %v281_v46 = vmul.f32 %v678_v53, %v71_v38  ;;  %v83_v8 = vld [vmem:[#allocation5 + $0x168] sm:$0xff]  ;;  %v84_v9 = vld [vmem:[#allocation5 + $0x170] sm:$0xff] }
  0x3c   :  { %389 = vst [vmem:[#allocation7 + $0xa8] sm:$0xff] %v269_v15  ;;  %390 = vst [vmem:[#allocation7 + $0xb0] sm:$0xff] %v270_v17  ;;  %v282_v47 = vmul.f32 %v638_v13, %v72_v39  ;;  %v283_v52 = vmul.f32 %v640_v14, %v73_v40  ;;  %v284_v57 = vmul.f32 %v642_v16, %v74_v54  ;;  %v85_v10 = vld [vmem:[#allocation5 + $0x178] sm:$0xff]  ;;  %v86_v17 = vld [vmem:[#allocation5 + $0x180] sm:$0xff] }
  0x3d   :  { %391 = vst [vmem:[#allocation7 + $0xb8] sm:$0xff] %v271_v19  ;;  %392 = vst [vmem:[#allocation7 + $0xc0] sm:$0xff] %v272_v27  ;;  %v285_v58 = vmul.f32 %v644_v18, %v75_v55  ;;  %v286_v59 = vmul.f32 %v646_v20, %v76_v56  ;;  %v287_v63 = vmul.f32 %v648_v22, %v77_v60  ;;  %v87_v19 = vld [vmem:[#allocation5 + $0x188] sm:$0xff]  ;;  %v88_v21 = vld [vmem:[#allocation5 + $0x190] sm:$0xff] }
  0x3e   :  { %393 = vst [vmem:[#allocation7 + $0xc8] sm:$0xff] %v273_v28  ;;  %394 = vst [vmem:[#allocation7 + $0xd0] sm:$0xff] %v274_v29  ;;  %v288_v0 = vmul.f32 %v650_v24, %v78_v61  ;;  %v289_v1 = vmul.f32 %v652_v26, %v79_v62  ;;  %v290_v5 = vmul.f32 %v662_v41, %v80_v2  ;;  %v89_v28 = vld [vmem:[#allocation5 + $0x198] sm:$0xff]  ;;  %v90_v29 = vld [vmem:[#allocation5 + $0x1a0] sm:$0xff] }
  0x3f   :  { %395 = vst [vmem:[#allocation7 + $0xd8] sm:$0xff] %v275_v30  ;;  %396 = vst [vmem:[#allocation7 + $0xe0] sm:$0xff] %v276_v34  ;;  %v291_v6 = vmul.f32 %v664_v42, %v81_v3  ;;  %v292_v7 = vmul.f32 %v666_v43, %v82_v4  ;;  %v293_v11 = vmul.f32 %v668_v44, %v83_v8  ;;  %v91_v30 = vld [vmem:[#allocation5 + $0x1a8] sm:$0xff]  ;;  %v92_v34 = vld [vmem:[#allocation5 + $0x1b0] sm:$0xff] }
  0x40   :  { %397 = vst [vmem:[#allocation7 + $0xe8] sm:$0xff] %v277_v35  ;;  %398 = vst [vmem:[#allocation7 + $0xf0] sm:$0xff] %v278_v36  ;;  %v294_v12 = vmul.f32 %v670_v48, %v84_v9  ;;  %v295_v15 = vmul.f32 %v672_v49, %v85_v10  ;;  %v296_v23 = vmul.f32 %v674_v50, %v86_v17  ;;  %v93_v35 = vld [vmem:[#allocation5 + $0x1b8] sm:$0xff]  ;;  %v94_v36 = vld [vmem:[#allocation5 + $0x1c0] sm:$0xff] }
  0x41   :  { %399 = vst [vmem:[#allocation7 + $0xf8] sm:$0xff] %v279_v37  ;;  %400 = vst [vmem:[#allocation7 + $0x100] sm:$0xff] %v280_v45  ;;  %v297_v25 = vmul.f32 %v676_v51, %v87_v19  ;;  %v298_v27 = vmul.f32 %v678_v53, %v88_v21  ;;  %v299_v31 = vmul.f32 %v638_v13, %v89_v28  ;;  %v95_v40 = vld [vmem:[#allocation5 + $0x1c8] sm:$0xff]  ;;  %v96_v45 = vld [vmem:[#allocation5 + $0x1d0] sm:$0xff] }
  0x42   :  { %401 = vst.msk [vmem:[#allocation7 + $0x108] sm:$0xff] %vm383_vm0, %v281_v46  ;;  %402 = vst [vmem:[#allocation7 + $0x110] sm:$0xff] %v282_v47  ;;  %v300_v32 = vmul.f32 %v640_v14, %v90_v29  ;;  %v301_v33 = vmul.f32 %v642_v16, %v91_v30  ;;  %v302_v37 = vmul.f32 %v644_v18, %v92_v34  ;;  %v97_v46 = vld [vmem:[#allocation5 + $0x1d8] sm:$0xff]  ;;  %v98_v55 = vld [vmem:[#allocation5 + $0x1e0] sm:$0xff] }
  0x43   :  { %403 = vst [vmem:[#allocation7 + $0x118] sm:$0xff] %v283_v52  ;;  %404 = vst [vmem:[#allocation7 + $0x120] sm:$0xff] %v284_v57  ;;  %v303_v38 = vmul.f32 %v646_v20, %v93_v35  ;;  %v304_v39 = vmul.f32 %v648_v22, %v94_v36  ;;  %v305_v47 = vmul.f32 %v650_v24, %v95_v40  ;;  %v99_v56 = vld [vmem:[#allocation5 + $0x1e8] sm:$0xff]  ;;  %v100_v57 = vld [vmem:[#allocation5 + $0x1f0] sm:$0xff] }
  0x44   :  { %405 = vst [vmem:[#allocation7 + $0x128] sm:$0xff] %v285_v58  ;;  %406 = vst [vmem:[#allocation7 + $0x130] sm:$0xff] %v286_v59  ;;  %v306_v52 = vmul.f32 %v652_v26, %v96_v45  ;;  %v307_v54 = vmul.f32 %v662_v41, %v97_v46  ;;  %v308_v58 = vmul.f32 %v664_v42, %v98_v55  ;;  %v101_v61 = vld [vmem:[#allocation5 + $0x1f8] sm:$0xff]  ;;  %v102_v62 = vld [vmem:[#allocation5 + $0x200] sm:$0xff] }
  0x45   :  { %407 = vst [vmem:[#allocation7 + $0x138] sm:$0xff] %v287_v63  ;;  %408 = vst [vmem:[#allocation7 + $0x140] sm:$0xff] %v288_v0  ;;  %v309_v59 = vmul.f32 %v666_v43, %v99_v56  ;;  %v310_v60 = vmul.f32 %v668_v44, %v100_v57  ;;  %v103_v63 = vld [vmem:[#allocation5 + $0x208] sm:$0xff]  ;;  %v311_v0 = vmul.f32 %v670_v48, %v101_v61  ;;  %v104_v3 = vld [vmem:[#allocation5 + $0x210] sm:$0xff] }
  0x46   :  { %409 = vst [vmem:[#allocation7 + $0x148] sm:$0xff] %v289_v1  ;;  %410 = vst [vmem:[#allocation7 + $0x150] sm:$0xff] %v290_v5  ;;  %v312_v1 = vmul.f32 %v672_v49, %v102_v62  ;;  %v313_v2 = vmul.f32 %v674_v50, %v103_v63  ;;  %v105_v4 = vld [vmem:[#allocation5 + $0x218] sm:$0xff]  ;;  %v106_v5 = vld [vmem:[#allocation5 + $0x220] sm:$0xff] }
  0x47   :  { %411 = vst [vmem:[#allocation7 + $0x158] sm:$0xff] %v291_v6  ;;  %412 = vst [vmem:[#allocation7 + $0x160] sm:$0xff] %v292_v7  ;;  %v314_v6 = vmul.f32 %v676_v51, %v104_v3  ;;  %v315_v7 = vmul.f32 %v678_v53, %v105_v4  ;;  %v316_v8 = vmul.f32 %v638_v13, %v106_v5  ;;  %v107_v9 = vld [vmem:[#allocation5 + $0x228] sm:$0xff]  ;;  %v108_v10 = vld [vmem:[#allocation5 + $0x230] sm:$0xff] }
  0x48   :  { %413 = vst [vmem:[#allocation7 + $0x168] sm:$0xff] %v293_v11  ;;  %414 = vst [vmem:[#allocation7 + $0x170] sm:$0xff] %v294_v12  ;;  %v109_v11 = vld [vmem:[#allocation5 + $0x238] sm:$0xff]  ;;  %v317_v12 = vmul.f32 %v640_v14, %v107_v9  ;;  %v110_v19 = vld [vmem:[#allocation5 + $0x240] sm:$0xff] }
  0x49   :  { %415 = vst [vmem:[#allocation7 + $0x178] sm:$0xff] %v295_v15  ;;  %416 = vst [vmem:[#allocation7 + $0x180] sm:$0xff] %v296_v23  ;;  %v318_v15 = vmul.f32 %v642_v16, %v108_v10  ;;  %v319_v17 = vmul.f32 %v644_v18, %v109_v11  ;;  %v111_v21 = vld [vmem:[#allocation5 + $0x248] sm:$0xff]  ;;  %v112_v23 = vld [vmem:[#allocation5 + $0x250] sm:$0xff] }
  0x4a   :  { %417 = vst [vmem:[#allocation7 + $0x188] sm:$0xff] %v297_v25  ;;  %418 = vst.msk [vmem:[#allocation7 + $0x190] sm:$0xff] %vm383_vm0, %v298_v27  ;;  %v320_v25 = vmul.f32 %v646_v20, %v110_v19  ;;  %v321_v27 = vmul.f32 %v648_v22, %v111_v21  ;;  %v322_v28 = vmul.f32 %v650_v24, %v112_v23  ;;  %v113_v29 = vld [vmem:[#allocation5 + $0x258] sm:$0xff]  ;;  %v114_v30 = vld [vmem:[#allocation5 + $0x260] sm:$0xff] }
  0x4b   :  { %419 = vst [vmem:[#allocation7 + $0x198] sm:$0xff] %v299_v31  ;;  %420 = vst [vmem:[#allocation7 + $0x1a0] sm:$0xff] %v300_v32  ;;  %v115_v31 = vld [vmem:[#allocation5 + $0x268] sm:$0xff]  ;;  %v323_v32 = vmul.f32 %v652_v26, %v113_v29  ;;  %v116_v35 = vld [vmem:[#allocation5 + $0x270] sm:$0xff] }
  0x4c   :  { %421 = vst [vmem:[#allocation7 + $0x1a8] sm:$0xff] %v301_v33  ;;  %422 = vst [vmem:[#allocation7 + $0x1b0] sm:$0xff] %v302_v37  ;;  %v324_v33 = vmul.f32 %v662_v41, %v114_v30  ;;  %v325_v34 = vmul.f32 %v664_v42, %v115_v31  ;;  %v117_v36 = vld [vmem:[#allocation5 + $0x278] sm:$0xff]  ;;  %v118_v37 = vld [vmem:[#allocation5 + $0x280] sm:$0xff] }
  0x4d   :  { %423 = vst [vmem:[#allocation7 + $0x1b8] sm:$0xff] %v303_v38  ;;  %424 = vst [vmem:[#allocation7 + $0x1c0] sm:$0xff] %v304_v39  ;;  %v326_v38 = vmul.f32 %v666_v43, %v116_v35  ;;  %v327_v39 = vmul.f32 %v668_v44, %v117_v36  ;;  %v328_v40 = vmul.f32 %v670_v48, %v118_v37  ;;  %v119_v45 = vld [vmem:[#allocation5 + $0x288] sm:$0xff]  ;;  %v120_v46 = vld [vmem:[#allocation5 + $0x290] sm:$0xff] }
  0x4e   :  { %425 = vst [vmem:[#allocation7 + $0x1c8] sm:$0xff] %v305_v47  ;;  %426 = vst [vmem:[#allocation7 + $0x1d0] sm:$0xff] %v306_v52  ;;  %v121_v47 = vld [vmem:[#allocation5 + $0x298] sm:$0xff]  ;;  %v329_v52 = vmul.f32 %v672_v49, %v119_v45  ;;  %v122_v56 = vld [vmem:[#allocation5 + $0x2a0] sm:$0xff] }
  0x4f   :  { %427 = vst [vmem:[#allocation7 + $0x1d8] sm:$0xff] %v307_v54  ;;  %428 = vst [vmem:[#allocation7 + $0x1e0] sm:$0xff] %v308_v58  ;;  %v330_v54 = vmul.f32 %v674_v50, %v120_v46  ;;  %v331_v55 = vmul.f32 %v676_v51, %v121_v47  ;;  %v123_v57 = vld [vmem:[#allocation5 + $0x2a8] sm:$0xff]  ;;  %v124_v58 = vld [vmem:[#allocation5 + $0x2b0] sm:$0xff] }
  0x50   :  { %429 = vst [vmem:[#allocation7 + $0x1e8] sm:$0xff] %v309_v59  ;;  %430 = vst [vmem:[#allocation7 + $0x1f0] sm:$0xff] %v310_v60  ;;  %v332_v59 = vmul.f32 %v678_v53, %v122_v56  ;;  %v333_v60 = vmul.f32 %v638_v13, %v123_v57  ;;  %v334_v61 = vmul.f32 %v640_v14, %v124_v58  ;;  %v125_v62 = vld [vmem:[#allocation5 + $0x2b8] sm:$0xff]  ;;  %v126_v63 = vld [vmem:[#allocation5 + $0x2c0] sm:$0xff] }
  0x51   :  { %431 = vst [vmem:[#allocation7 + $0x1f8] sm:$0xff] %v311_v0  ;;  %432 = vst [vmem:[#allocation7 + $0x200] sm:$0xff] %v312_v1  ;;  %v127_v0 = vld [vmem:[#allocation5 + $0x2c8] sm:$0xff]  ;;  %v335_v1 = vmul.f32 %v642_v16, %v125_v62  ;;  %v128_v4 = vld [vmem:[#allocation5 + $0x2d0] sm:$0xff] }
  0x52   :  { %433 = vst [vmem:[#allocation7 + $0x208] sm:$0xff] %v313_v2  ;;  %434 = vst [vmem:[#allocation7 + $0x210] sm:$0xff] %v314_v6  ;;  %v336_v2 = vmul.f32 %v644_v18, %v126_v63  ;;  %v337_v3 = vmul.f32 %v646_v20, %v127_v0  ;;  %v129_v5 = vld [vmem:[#allocation5 + $0x2d8] sm:$0xff]  ;;  %v130_v6 = vld [vmem:[#allocation5 + $0x2e0] sm:$0xff] }
  0x53   :  { %435 = vst.msk [vmem:[#allocation7 + $0x218] sm:$0xff] %vm383_vm0, %v315_v7  ;;  %436 = vst [vmem:[#allocation7 + $0x220] sm:$0xff] %v316_v8  ;;  %v338_v7 = vmul.f32 %v648_v22, %v128_v4  ;;  %v339_v8 = vmul.f32 %v650_v24, %v129_v5  ;;  %v340_v9 = vmul.f32 %v652_v26, %v130_v6  ;;  %v131_v10 = vld [vmem:[#allocation5 + $0x2e8] sm:$0xff]  ;;  %v132_v11 = vld [vmem:[#allocation5 + $0x2f0] sm:$0xff] }
  0x54   :  { %437 = vst [vmem:[#allocation7 + $0x228] sm:$0xff] %v317_v12  ;;  %438 = vst [vmem:[#allocation7 + $0x230] sm:$0xff] %v318_v15  ;;  %v133_v12 = vld [vmem:[#allocation5 + $0x2f8] sm:$0xff]  ;;  %v341_v15 = vmul.f32 %v662_v41, %v131_v10  ;;  %v134_v21 = vld [vmem:[#allocation5 + $0x300] sm:$0xff] }
  0x55   :  { %439 = vst [vmem:[#allocation7 + $0x238] sm:$0xff] %v319_v17  ;;  %440 = vst [vmem:[#allocation7 + $0x240] sm:$0xff] %v320_v25  ;;  %v342_v17 = vmul.f32 %v664_v42, %v132_v11  ;;  %v343_v19 = vmul.f32 %v666_v43, %v133_v12  ;;  %v135_v23 = vld [vmem:[#allocation5 + $0x308] sm:$0xff]  ;;  %v136_v25 = vld [vmem:[#allocation5 + $0x310] sm:$0xff] }
  0x56   :  { %441 = vst [vmem:[#allocation7 + $0x248] sm:$0xff] %v321_v27  ;;  %442 = vst [vmem:[#allocation7 + $0x250] sm:$0xff] %v322_v28  ;;  %v344_v27 = vmul.f32 %v668_v44, %v134_v21  ;;  %v345_v28 = vmul.f32 %v670_v48, %v135_v23  ;;  %v346_v29 = vmul.f32 %v672_v49, %v136_v25  ;;  %v137_v30 = vld [vmem:[#allocation5 + $0x318] sm:$0xff]  ;;  %v138_v31 = vld [vmem:[#allocation5 + $0x320] sm:$0xff] }
  0x57   :  { %443 = vst [vmem:[#allocation7 + $0x258] sm:$0xff] %v323_v32  ;;  %444 = vst [vmem:[#allocation7 + $0x260] sm:$0xff] %v324_v33  ;;  %v139_v32 = vld [vmem:[#allocation5 + $0x328] sm:$0xff]  ;;  %v347_v33 = vmul.f32 %v674_v50, %v137_v30  ;;  %v140_v36 = vld [vmem:[#allocation5 + $0x330] sm:$0x1] }
  0x58   :  { %445 = vst [vmem:[#allocation7 + $0x268] sm:$0xff] %v325_v34  ;;  %446 = vst [vmem:[#allocation7 + $0x270] sm:$0xff] %v326_v38  ;;  %v348_v34 = vmul.f32 %v676_v51, %v138_v31  ;;  %v349_v35 = vmul.f32 %v678_v53, %v139_v32  ;;  %v141_v37 = vld [vmem:[#allocation5 + $0x338] sm:$0x1]  ;;  %v142_v38 = vld [vmem:[#allocation5 + $0x340] sm:$0x1] }
  0x59   :  { %447 = vst [vmem:[#allocation7 + $0x278] sm:$0xff] %v327_v39  ;;  %448 = vst [vmem:[#allocation7 + $0x280] sm:$0xff] %v328_v40  ;;  %v350_v39 = vmul.f32 %v638_v13, %v140_v36  ;;  %v351_v40 = vmul.f32 %v640_v14, %v141_v37  ;;  %v352_v45 = vmul.f32 %v642_v16, %v142_v38  ;;  %v143_v46 = vld [vmem:[#allocation5 + $0x348] sm:$0x1]  ;;  %v144_v47 = vld [vmem:[#allocation5 + $0x350] sm:$0x1] }
  0x5a   :  { %449 = vst [vmem:[#allocation7 + $0x288] sm:$0xff] %v329_v52  ;;  %450 = vst [vmem:[#allocation7 + $0x290] sm:$0xff] %v330_v54  ;;  %v145_v52 = vld [vmem:[#allocation5 + $0x358] sm:$0x1]  ;;  %v353_v54 = vmul.f32 %v644_v18, %v143_v46  ;;  %v146_v57 = vld [vmem:[#allocation5 + $0x360] sm:$0x1] }
  0x5b   :  { %451 = vst [vmem:[#allocation7 + $0x298] sm:$0xff] %v331_v55  ;;  %452 = vst.msk [vmem:[#allocation7 + $0x2a0] sm:$0xff] %vm383_vm0, %v332_v59  ;;  %v354_v55 = vmul.f32 %v646_v20, %v144_v47  ;;  %v355_v56 = vmul.f32 %v648_v22, %v145_v52  ;;  %v147_v58 = vld [vmem:[#allocation5 + $0x368] sm:$0x1]  ;;  %v148_v13 = vld [vmem:[#allocation5 + $0x370] sm:$0x1]  ;;  %v356_v14 = vmul.f32 %v650_v24, %v146_v57 }
  0x5c   :  { %453 = vst [vmem:[#allocation7 + $0x2a8] sm:$0xff] %v333_v60  ;;  %454 = vst [vmem:[#allocation7 + $0x2b0] sm:$0xff] %v334_v61  ;;  %v357_v16 = vmul.f32 %v652_v26, %v147_v58  ;;  %v358_v59 = vmul.f32 %v662_v41, %v148_v13  ;;  %v149_v60 = vld [vmem:[#allocation5 + $0x378] sm:$0x1]  ;;  %v150_v61 = vld [vmem:[#allocation5 + $0x380] sm:$0x1] }
  0x5d   :  { %455 = vst [vmem:[#allocation7 + $0x2b8] sm:$0xff] %v335_v1  ;;  %456 = vst [vmem:[#allocation7 + $0x2c0] sm:$0xff] %v336_v2  ;;  %v151_v62 = vld [vmem:[#allocation5 + $0x388] sm:$0x1]  ;;  %v359_v18 = vmul.f32 %v664_v42, %v149_v60  ;;  %v360_v20 = vmul.f32 %v666_v43, %v150_v61  ;;  %v152_v63 = vld [vmem:[#allocation5 + $0x390] sm:$0x1] }
  0x5e   :  { %457 = vst [vmem:[#allocation7 + $0x2c8] sm:$0xff] %v337_v3  ;;  %458 = vst [vmem:[#allocation7 + $0x2d0] sm:$0xff] %v338_v7  ;;  %v361_v22 = vmul.f32 %v668_v44, %v151_v62  ;;  %v153_v0 = vld [vmem:[#allocation5 + $0x398] sm:$0x1]  ;;  %v154_v24 = vld [vmem:[#allocation5 + $0x3a0] sm:$0x1]  ;;  %v362_v26 = vmul.f32 %v670_v48, %v152_v63 }
  0x5f   :  { %459 = vst [vmem:[#allocation7 + $0x2d8] sm:$0xff] %v339_v8  ;;  %460 = vst [vmem:[#allocation7 + $0x2e0] sm:$0xff] %v340_v9  ;;  %v363_v41 = vmul.f32 %v672_v49, %v153_v0  ;;  %v364_v1 = vmul.f32 %v674_v50, %v154_v24  ;;  %v155_v2 = vld [vmem:[#allocation5 + $0x3a8] sm:$0x1]  ;;  %v156_v3 = vld [vmem:[#allocation5 + $0x3b0] sm:$0x1] }
  0x60   :  { %461 = vst [vmem:[#allocation7 + $0x2e8] sm:$0xff] %v341_v15  ;;  %462 = vst [vmem:[#allocation7 + $0x2f0] sm:$0xff] %v342_v17  ;;  %v365_v42 = vmul.f32 %v676_v51, %v155_v2  ;;  %v366_v43 = vmul.f32 %v678_v53, %v156_v3 }
  0x61   :  { %463 = vst [vmem:[#allocation7 + $0x2f8] sm:$0xff] %v343_v19  ;;  %464 = vst [vmem:[#allocation7 + $0x300] sm:$0xff] %v344_v27 }
  0x62   :  { %465 = vst [vmem:[#allocation7 + $0x308] sm:$0xff] %v345_v28  ;;  %466 = vst [vmem:[#allocation7 + $0x310] sm:$0xff] %v346_v29 }
  0x63   :  { %467 = vst [vmem:[#allocation7 + $0x318] sm:$0xff] %v347_v33  ;;  %468 = vst [vmem:[#allocation7 + $0x320] sm:$0xff] %v348_v34 }
  0x64   :  { %469 = vst.msk [vmem:[#allocation7 + $0x328] sm:$0xff] %vm383_vm0, %v349_v35  ;;  %470 = vst [vmem:[#allocation7 + $0x330] sm:$0x1] %v350_v39 }
  0x65   :  { %471 = vst [vmem:[#allocation7 + $0x338] sm:$0x1] %v351_v40  ;;  %472 = vst [vmem:[#allocation7 + $0x340] sm:$0x1] %v352_v45 }
  0x66   :  { %473 = vst [vmem:[#allocation7 + $0x348] sm:$0x1] %v353_v54  ;;  %474 = vst [vmem:[#allocation7 + $0x350] sm:$0x1] %v354_v55 }
  0x67   :  { %475 = vst [vmem:[#allocation7 + $0x358] sm:$0x1] %v355_v56  ;;  %476 = vst [vmem:[#allocation7 + $0x360] sm:$0x1] %v356_v14 }
  0x68   :  { %477 = vst [vmem:[#allocation7 + $0x368] sm:$0x1] %v357_v16  ;;  %478 = vst [vmem:[#allocation7 + $0x370] sm:$0x1] %v358_v59 }
  0x69   :  { %479 = vst [vmem:[#allocation7 + $0x378] sm:$0x1] %v359_v18  ;;  %480 = vst [vmem:[#allocation7 + $0x380] sm:$0x1] %v360_v20 }
  0x6a   :  { %481 = vst [vmem:[#allocation7 + $0x388] sm:$0x1] %v361_v22  ;;  %482 = vst [vmem:[#allocation7 + $0x390] sm:$0x1] %v362_v26 }
  0x6b   :  { %483 = vst [vmem:[#allocation7 + $0x398] sm:$0x1] %v363_v41  ;;  %484 = vst [vmem:[#allocation7 + $0x3a0] sm:$0x1] %v364_v1 }
  0x6c   :  { %485 = vst [vmem:[#allocation7 + $0x3a8] sm:$0x1] %v365_v42  ;;  %487 = vst.msk [vmem:[#allocation7 + $0x3b0] sm:$0x1] %vm486_vm1, %v366_v43 }
  0x6d   :  { %567 = shalt.err (!%p564_p6)
}
  0x6e   :  { %s568_s11 = scalar_lea.hbm %s817_s2, 15232 }
  0x6f   :  { %p569_p7 = scmp.ne.s32.totalorder %s817_s2, %s568_s11  ;;  %p572_p8 = scmp.lt.u32.totalorder %s568_s11, %s817_s2 }
  0x71   :  { %p574_p9 = pnand %p572_p8, %p569_p7 }
  0x73   :  { %577 = shalt.err (!%p574_p9)
}
  0x74   :  { %499 = dma.vmem_to_hbm [thread:$0]  %s494_s7, 15232, %s817_s2, [#allocation4], %s586_s0, %s586_s0, %s587_s4  }
  0x75   :  { %582 = dma.done.wait [#allocation4], 15232  }
  0x76   :  { %583 = vsyncadd [#allocation4], 4294952064 }
  0x77   :  { %503 = vsyncpa [#allocation3], 1 }
  0x78   :  { %504 = vsyncpa [#allocation6], 1 }
  0x79   :  { %505 = vsyncpa [#allocation4], 1 }

</bundles_post_ra>
